<compile_context>
chip_gen: v6e
topology: v6e:2x2x1
jax: 0.10.0
libtpu: 0.0.40
codegen_flags: <defaults>
</compile_context>

<pallas_src>
import math

import jax
import jax.numpy as jnp
from jax import lax
from jax.experimental import pallas as pl
from jax.experimental.pallas import tpu as pltpu


def _pick_tile(n, candidates):
    """Largest candidate that divides n, else n itself (full-extent block)."""
    for c in candidates:
        if n % c == 0:
            return c
    return n


def _qkv_proj_kernel(x_ref, w_ref, o_ref):
    # (tm, d_model) @ (d_model, 3P) -> (tm, 3P); operands fed at native dtype,
    # f32 accumulation on the MXU.
    o_ref[...] = jnp.dot(
        x_ref[...], w_ref[...], preferred_element_type=jnp.float32
    ).astype(o_ref.dtype)


def _flash_attn_kernel(q_ref, k_ref, v_ref, o_ref, m_sc, l_sc, acc_sc):
    ki = pl.program_id(2)

    @pl.when(ki == 0)
    def _():
        m_sc[...] = jnp.full_like(m_sc, -jnp.inf)
        l_sc[...] = jnp.zeros_like(l_sc)
        acc_sc[...] = jnp.zeros_like(acc_sc)

    # scores (tq, tk): contract the padded head dim of q and k directly
    # (lax.dot_general contraction dims -> no XLU transpose of k).
    # 1/sqrt(d_k) is already folded into the query weight in the wrapper.
    s = lax.dot_general(
        q_ref[...], k_ref[...],
        dimension_numbers=(((1,), (1,)), ((), ())),
        preferred_element_type=jnp.float32,
    )

    m_prev = m_sc[...]
    m_new = jnp.maximum(m_prev, jnp.max(s, axis=-1, keepdims=True))
    alpha = jnp.exp(m_prev - m_new)
    p = jnp.exp(s - m_new)
    l_sc[...] = alpha * l_sc[...] + jnp.sum(p, axis=-1, keepdims=True)
    acc_sc[...] = alpha * acc_sc[...] + jnp.dot(
        p.astype(v_ref.dtype), v_ref[...], preferred_element_type=jnp.float32
    )
    m_sc[...] = m_new

    @pl.when(ki == pl.num_programs(2) - 1)
    def _():
        inv_l = pl.reciprocal(l_sc[...], approx=True)   # EUP slot; VALU stays free
        o_ref[...] = (acc_sc[...] * inv_l).astype(o_ref.dtype)


def attention_pallas(x, w_query, w_key, w_value):
    """x: (B, S, d_model); w_*: (d_out, d_model) PyTorch-layout weights (bias-free)."""
    B, S, d_model = x.shape
    d_k = w_query.shape[0]
    d_v = w_value.shape[0]
    out_dtype = x.dtype

    # Common padded head width: 128-lane aligned slices and lane-dense stores.
    P = 128 * pl.cdiv(max(d_k, d_v), 128)

    # Fused, pre-transposed, padded QKV weight — built once in the wrapper.
    scale = 1.0 / math.sqrt(d_k)
    w_fused = jnp.zeros((d_model, 3 * P), dtype=x.dtype)
    w_fused = w_fused.at[:, 0:d_k].set((w_query.T * scale).astype(x.dtype))
    w_fused = w_fused.at[:, P:P + d_k].set(w_key.T.astype(x.dtype))
    w_fused = w_fused.at[:, 2 * P:2 * P + d_v].set(w_value.T.astype(x.dtype))

    # ---- Phase 1: fused QKV projection over flattened rows (M = B*S) ----
    M = B * S
    x2d = x.reshape(M, d_model)
    tm = _pick_tile(M, (512, 256, 128, 64, 32, 16, 8))
    qkv = pl.pallas_call(
        _qkv_proj_kernel,
        out_shape=jax.ShapeDtypeStruct((M, 3 * P), out_dtype),
        grid_spec=pltpu.PrefetchScalarGridSpec(
            num_scalar_prefetch=0,
            grid=(M // tm,),
            in_specs=[
                pl.BlockSpec((tm, d_model), lambda i: (i, 0)),
                pl.BlockSpec((d_model, 3 * P), lambda i: (0, 0)),  # weight stays resident
            ],
            out_specs=pl.BlockSpec((tm, 3 * P), lambda i: (i, 0)),
        ),
        compiler_params=pltpu.CompilerParams(
            dimension_semantics=("parallel",)),
    )(x2d, w_fused)

    qkv3 = qkv.reshape(B, S, 3 * P)

    # ---- Phase 2: flash attention, online softmax over KV tiles ----
    tq = _pick_tile(S, (256, 128, 64, 32, 16, 8))
    tk = _pick_tile(S, (512, 256, 128, 64, 32, 16, 8))

    # q / k / v are 128-aligned column blocks (0 / 1 / 2) of the same qkv array.
    q_spec = pl.BlockSpec((pl.Squeezed(), tq, P), lambda b, qi, ki: (b, qi, 0))
    k_spec = pl.BlockSpec((pl.Squeezed(), tk, P), lambda b, qi, ki: (b, ki, 1))
    v_spec = pl.BlockSpec((pl.Squeezed(), tk, P), lambda b, qi, ki: (b, ki, 2))
    o_spec = pl.BlockSpec((pl.Squeezed(), tq, P), lambda b, qi, ki: (b, qi, 0))

    out_pad = pl.pallas_call(
        _flash_attn_kernel,
        out_shape=jax.ShapeDtypeStruct((B, S, P), out_dtype),
        grid_spec=pltpu.PrefetchScalarGridSpec(
            num_scalar_prefetch=0,
            grid=(B, S // tq, S // tk),
            in_specs=[q_spec, k_spec, v_spec],
            out_specs=o_spec,
            scratch_shapes=[
                pltpu.VMEM((tq, 1), jnp.float32),   # running max m
                pltpu.VMEM((tq, 1), jnp.float32),   # running denom l
                pltpu.VMEM((tq, P), jnp.float32),   # running numerator acc
            ],
        ),
        compiler_params=pltpu.CompilerParams(
            dimension_semantics=("parallel", "parallel", "arbitrary")),
    )(qkv3, qkv3, qkv3)

    # Padded V columns are exactly zero -> dropping them recovers the module output.
    return out_pad[..., :d_v]


def attention_reference(x, w_query, w_key, w_value):
    """Pure-JAX reference mirroring the PyTorch forward (mask=None, query=None)."""
    q = jnp.einsum("bsd,kd->bsk", x, w_query)
    k = jnp.einsum("bsd,kd->bsk", x, w_key)
    v = jnp.einsum("bsd,vd->bsv", x, w_value)
    scores = jnp.einsum("bqk,bsk->bqs", q, k) / math.sqrt(w_query.shape[0])
    weights = jax.nn.softmax(scores, axis=-1)
    return jnp.einsum("bqs,bsv->bqv", weights, v)


if __name__ == "__main__":
    # Small shapes consistent with the module: batch=2, seq=128, d_model=128,
    # d_key=d_value=64 (module defaults use 512/64/64; these are scaled down).
    B, S, d_model, d_key, d_value = 2, 128, 128, 64, 64

    key = jax.random.PRNGKey(0)
    kx, kq, kk, kv = jax.random.split(key, 4)

    x = jax.random.normal(kx, (B, S, d_model), dtype=jnp.float32)

    # Deterministic PyTorch-style Linear weight init (uniform in +-1/sqrt(fan_in)).
    bound = 1.0 / math.sqrt(d_model)
    w_query = jax.random.uniform(kq, (d_key, d_model), jnp.float32, -bound, bound)
    w_key = jax.random.uniform(kk, (d_key, d_model), jnp.float32, -bound, bound)
    w_value = jax.random.uniform(kv, (d_value, d_model), jnp.float32, -bound, bound)

    out = attention_pallas(x, w_query, w_key, w_value)
    out = jax.block_until_ready(out)

    ref = attention_reference(x, w_query, w_key, w_value)
    assert out.shape == (B, S, d_value), out.shape
    # approx=True reciprocal (EUP vrcp) in the kernel -> slightly relaxed tolerance.
    assert jnp.allclose(out, ref, atol=5e-3, rtol=5e-3), float(jnp.max(jnp.abs(out - ref)))

    print("KERNEL_OK")
</pallas_src>

<mosaic_0001>
module attributes {stable_mosaic.version = 11 : i64} {
  func.func @_qkv_proj_kernel(%arg0: i32, %arg1: memref<256x128xf32, #tpu.memory_space<vmem>>, %arg2: memref<128x384xf32, #tpu.memory_space<vmem>>, %arg3: memref<256x384xf32, #tpu.memory_space<vmem>>) attributes {dimension_semantics = [#tpu.dimension_semantics<parallel>], iteration_bounds = array<i64: 1>, scalar_prefetch = 0 : i64, scratch_operands = 0 : i64, tpu.core_type = #tpu.core_type<tc>, window_params = [{transform_indices = @transform_0, window_bounds = array<i64: 256, 128>}, {pipeline_mode = #tpu.pipeline_mode<synchronous>, transform_indices = @transform_1, window_bounds = array<i64: 128, 384>}, {transform_indices = @transform_2, window_bounds = array<i64: 256, 384>}]} {
    %c0 = arith.constant 0 : index
    %c0_0 = arith.constant 0 : index
    %0 = vector.load %arg1[%c0, %c0_0] : memref<256x128xf32, #tpu.memory_space<vmem>>, vector<256x128xf32>
    %c0_1 = arith.constant 0 : index
    %c0_2 = arith.constant 0 : index
    %1 = vector.load %arg2[%c0_1, %c0_2] : memref<128x384xf32, #tpu.memory_space<vmem>>, vector<128x384xf32>
    %cst = arith.constant dense<0.000000e+00> : vector<256x384xf32>
    %2 = tpu.matmul %0, %1, %cst {dimension_numbers = #tpu.dot_dimension_numbers<[1], [0], [0], [1], [0, 0, 1, 1], [], []>} : vector<256x128xf32>, vector<128x384xf32>, vector<256x384xf32> -> vector<256x384xf32>
    %c0_3 = arith.constant 0 : index
    %c0_4 = arith.constant 0 : index
    %3 = vector.load %arg3[%c0_3, %c0_4] : memref<256x384xf32, #tpu.memory_space<vmem>>, vector<256x384xf32>
    tpu.vector_store %arg3[%c0_3, %c0_4], %2 {strides = array<i32>} : memref<256x384xf32, #tpu.memory_space<vmem>>, vector<256x384xf32>,
    return
  }
  func.func @transform_0(%arg0: i32) -> (i32, i32) {
    %c0_i32 = arith.constant 0 : i32
    %c0_i32_0 = arith.constant 0 : i32
    return %arg0, %c0_i32 : i32, i32
  }
  func.func @transform_1(%arg0: i32) -> (i32, i32) {
    %c0_i32 = arith.constant 0 : i32
    %c0_i32_0 = arith.constant 0 : i32
    %c0_i32_1 = arith.constant 0 : i32
    return %c0_i32, %c0_i32_0 : i32, i32
  }
  func.func @transform_2(%arg0: i32) -> (i32, i32) {
    %c0_i32 = arith.constant 0 : i32
    %c0_i32_0 = arith.constant 0 : i32
    return %arg0, %c0_i32 : i32, i32
  }
}

</mosaic_0001>

<bundles_post_ra>
// kernel: tpu_custom_call.1
= control target key start
LH: loop header
LB: loop body
LE: loop exit
PB: predicated region body
PF: predicated region fallthrough
CT: control target
= control target key end

     0   :  { %7 = vsyncpa [#allocation3], 0  ;;  %s1068_s0 = inlined_call_operand.hbm [shape: f32[256,128], index: 0, kind: input, shape index: {}]   ;;  %s1069_s1 = inlined_call_operand.hbm [shape: f32[128,384], index: 1, kind: input, shape index: {}]   ;;  %s1070_s2 = inlined_call_operand.hbm [shape: f32[256,384], index: 2, kind: output, shape index: {}]  }
   0x1   :  { %8 = vsyncpa [#allocation6], 0 }
   0x2   :  { %9 = vsyncpa [#allocation4], 0  ;;  %s950_s9 = smov [#allocation2]  }
   0x3   :  { %s15_s10 = sshll.u32 %s950_s9, 4  ;;  %s16_s10 = int_to_ptr.vmem [resolvable:$true] %s15_s10 }
   0x4   :  { %s892_s11 = scalar_lea.vmem %s16_s10, 4096  ;;  %p897_p1 = scmp.lt.s32.totalorder %s16_s10, %s16_s10 }
   0x5   :  { %p893_p0 = scmp.ne.s32.totalorder %s16_s10, %s892_s11  ;;  %p898_p2 = scmp.lt.s32.totalorder %s892_s11, %s892_s11 }
   0x7   :  { %p899_p3 = por %p898_p2, %p897_p1 }
   0x9   :  { %p900_p4 = pnand %p899_p3, %p893_p0 }
   0xb   :  { %903 = shalt.err (!%p900_p4)
}
   0xc   :  { %s951_s12 = smov 128   ;;  %s952_s13 = smov 8  }
   0xd   :  { %21 = dma.hbm_to_vmem [thread:$0]  %s1068_s0, 4096, %s16_s10, [#allocation3], %s951_s12, %s951_s12, %s952_s13  }
   0xe   :  { %s953_s16 = smov [#allocation5]  }
   0xf   :  { %s27_s17 = sshll.u32 %s953_s16, 4  ;;  %s28_s17 = int_to_ptr.vmem [resolvable:$true] %s27_s17 }
  0x10   :  { %s912_s18 = scalar_lea.vmem %s28_s17, 6144  ;;  %p917_p6 = scmp.lt.s32.totalorder %s28_s17, %s28_s17 }
  0x11   :  { %p913_p5 = scmp.ne.s32.totalorder %s28_s17, %s912_s18  ;;  %p918_p7 = scmp.lt.s32.totalorder %s912_s18, %s912_s18 }
  0x13   :  { %p919_p8 = por %p918_p7, %p917_p6 }
  0x15   :  { %p920_p9 = pnand %p919_p8, %p913_p5 }
  0x17   :  { %923 = shalt.err (!%p920_p9)
}
  0x18   :  { %s954_s19 = smov 384   ;;  %s955_s20 = smov 24  }
  0x19   :  { %33 = dma.hbm_to_vmem [thread:$0]  %s1069_s1, 6144, %s28_s17, [#allocation6], %s954_s19, %s954_s19, %s955_s20  }
  0x1a   :  { %944 = dma.done.wait [#allocation3], 4096  }
  0x1b   :  { %945 = vsyncadd [#allocation3], 4294963200 }
  0x1c   :  { %946 = dma.done.wait [#allocation6], 6144  }
  0x1d   :  { %947 = vsyncadd [#allocation6], 4294961152  ;;  %v956_v0 = vmov 0.0   ;;  %v118_v1 = vld [vmem:[#allocation5 + $0x170] sm:$0xff]  ;;  %v117_v2 = vld [vmem:[#allocation5 + $0x168] sm:$0xff]  ;;  %s957_s0 = smov [#allocation7]  }
  0x1e   :  { %184 = vmatprep.mubr.f32.mxu0 %v956_v0  ;;  %328 = vmatprep.mubr.f32.mxu1 %v956_v0  ;;  %v115_v3 = vld [vmem:[#allocation5 + $0x158] sm:$0xff]  ;;  %v114_v4 = vld [vmem:[#allocation5 + $0x150] sm:$0xff]  ;;  %v112_v5 = vld [vmem:[#allocation5 + $0x140] sm:$0xff]  ;;  %s703_s1 = sshll.u32 %s957_s0, 4  ;;  %s704_s1 = int_to_ptr.vmem [resolvable:$true] %s703_s1 }
  0x1f   :  { %120 = vmatprep.subr.mxu0 %v118_v1  ;;  %844 = vmatprep.subr.mxu1 %v118_v1  ;;  %v111_v6 = vld [vmem:[#allocation5 + $0x138] sm:$0xff]  ;;  %v109_v7 = vld [vmem:[#allocation5 + $0x128] sm:$0xff]  ;;  %v108_v8 = vld [vmem:[#allocation5 + $0x120] sm:$0xff]  ;;  %s924_s23 = scalar_lea.vmem %s704_s1, 12288  ;;  %p929_p11 = scmp.lt.s32.totalorder %s704_s1, %s704_s1 }
  0x20   :  { %121 = vmatpush1.msra.mxu0 %v117_v2  ;;  %860 = vmatpush1.msra.mxu1 %v117_v2  ;;  %v106_v9 = vld [vmem:[#allocation5 + $0x110] sm:$0xff]  ;;  %v105_v10 = vld [vmem:[#allocation5 + $0x108] sm:$0xff]  ;;  %v103_v11 = vld [vmem:[#allocation5 + $0xf8] sm:$0xff]  ;;  %p925_p10 = scmp.ne.s32.totalorder %s704_s1, %s924_s23  ;;  %p930_p12 = scmp.lt.s32.totalorder %s924_s23, %s924_s23 }
  0x21   :  { %122 = vmatprep.subr.mxu0 %v115_v3  ;;  %845 = vmatprep.subr.mxu1 %v115_v3  ;;  %v102_v12 = vld [vmem:[#allocation5 + $0xf0] sm:$0xff]  ;;  %v100_v13 = vld [vmem:[#allocation5 + $0xe0] sm:$0xff]  ;;  %v99_v14 = vld [vmem:[#allocation5 + $0xd8] sm:$0xff] }
  0x22   :  { %123 = vmatpush1.msra.mxu0 %v114_v4  ;;  %861 = vmatpush1.msra.mxu1 %v114_v4  ;;  %v97_v15 = vld [vmem:[#allocation5 + $0xc8] sm:$0xff]  ;;  %v96_v16 = vld [vmem:[#allocation5 + $0xc0] sm:$0xff]  ;;  %v94_v17 = vld [vmem:[#allocation5 + $0xb0] sm:$0xff]  ;;  %p931_p13 = por %p930_p12, %p929_p11 }
  0x23   :  { %124 = vmatprep.subr.mxu0 %v112_v5  ;;  %846 = vmatprep.subr.mxu1 %v112_v5  ;;  %v93_v18 = vld [vmem:[#allocation5 + $0xa8] sm:$0xff]  ;;  %v91_v19 = vld [vmem:[#allocation5 + $0x98] sm:$0xff]  ;;  %v90_v20 = vld [vmem:[#allocation5 + $0x90] sm:$0xff] }
  0x24   :  { %125 = vmatpush1.msra.mxu0 %v111_v6  ;;  %862 = vmatpush1.msra.mxu1 %v111_v6  ;;  %v88_v21 = vld [vmem:[#allocation5 + $0x80] sm:$0xff]  ;;  %v87_v22 = vld [vmem:[#allocation5 + $0x78] sm:$0xff]  ;;  %v85_v23 = vld [vmem:[#allocation5 + $0x68] sm:$0xff]  ;;  %p932_p0 = pnand %p931_p13, %p925_p10 }
  0x25   :  { %126 = vmatprep.subr.mxu0 %v109_v7  ;;  %847 = vmatprep.subr.mxu1 %v109_v7  ;;  %v84_v24 = vld [vmem:[#allocation5 + $0x60] sm:$0xff]  ;;  %v82_v25 = vld [vmem:[#allocation5 + $0x50] sm:$0xff]  ;;  %v81_v26 = vld [vmem:[#allocation5 + $0x48] sm:$0xff] }
  0x26   :  { %127 = vmatpush1.msra.mxu0 %v108_v8  ;;  %863 = vmatpush1.msra.mxu1 %v108_v8  ;;  %v79_v27 = vld [vmem:[#allocation5 + $0x38] sm:$0xff]  ;;  %v78_v28 = vld [vmem:[#allocation5 + $0x30] sm:$0xff]  ;;  %v76_v29 = vld [vmem:[#allocation5 + $0x20] sm:$0xff] }
  0x27   :  { %128 = vmatprep.subr.mxu0 %v106_v9  ;;  %848 = vmatprep.subr.mxu1 %v106_v9  ;;  %v75_v30 = vld [vmem:[#allocation5 + $0x18] sm:$0xff]  ;;  %v73_v31 = vld [vmem:[#allocation5 + $0x8] sm:$0xff]  ;;  %v72_v32 = vld [vmem:[#allocation5] sm:$0xff] }
  0x28   :  { %129 = vmatpush1.msra.mxu0 %v105_v10  ;;  %864 = vmatpush1.msra.mxu1 %v105_v10  ;;  %v984_v33 = vld [vmem:[#allocation2] sm:$0xff]  ;;  %v119_v35 = vld [vmem:[#allocation5 + $0x178] sm:$0xff]  ;;  %v991_v37 = vld [vmem:[#allocation2 + $0x8] sm:$0xff] }
  0x29   :  { %130 = vmatprep.subr.mxu0 %v103_v11  ;;  %849 = vmatprep.subr.mxu1 %v103_v11  ;;  %v986_v34 = vld [vmem:[#allocation2 + $0xc0] sm:$0xff]  ;;  %v994_v38 = vld [vmem:[#allocation2 + $0xc8] sm:$0xff]  ;;  %v110_v40 = vld [vmem:[#allocation5 + $0x130] sm:$0xff] }
  0x2a   :  { %131 = vmatpush1.msra.mxu0 %v102_v12  ;;  %865 = vmatpush1.msra.mxu1 %v102_v12  ;;  %v116_v36 = vld [vmem:[#allocation5 + $0x160] sm:$0xff]  ;;  %v113_v39 = vld [vmem:[#allocation5 + $0x148] sm:$0xff]  ;;  %v998_v41 = vld [vmem:[#allocation2 + $0x10] sm:$0xff] }
  0x2b   :  { %132 = vmatprep.subr.mxu0 %v100_v13  ;;  %850 = vmatprep.subr.mxu1 %v100_v13  ;;  %v1001_v42 = vld [vmem:[#allocation2 + $0xd0] sm:$0xff]  ;;  %v107_v43 = vld [vmem:[#allocation5 + $0x118] sm:$0xff]  ;;  %v104_v44 = vld [vmem:[#allocation5 + $0x100] sm:$0xff] }
  0x2c   :  { %133 = vmatpush1.msra.mxu0 %v99_v14  ;;  %866 = vmatpush1.msra.mxu1 %v99_v14  ;;  %v1006_v45 = vld [vmem:[#allocation2 + $0x18] sm:$0xff]  ;;  %v101_v47 = vld [vmem:[#allocation5 + $0xe8] sm:$0xff]  ;;  %v98_v48 = vld [vmem:[#allocation5 + $0xd0] sm:$0xff] }
  0x2d   :  { %134 = vmatprep.subr.mxu0 %v97_v15  ;;  %851 = vmatprep.subr.mxu1 %v97_v15  ;;  %v1009_v46 = vld [vmem:[#allocation2 + $0xd8] sm:$0xff]  ;;  %v44_v49 = vld [vmem:[#allocation2 + $0x20] sm:$0xff]  ;;  %v45_v53 = vld [vmem:[#allocation2 + $0x28] sm:$0xff] }
  0x2e   :  { %135 = vmatpush1.msra.mxu0 %v96_v16  ;;  %867 = vmatpush1.msra.mxu1 %v96_v16  ;;  %v1015_v50 = vld [vmem:[#allocation2 + $0xe0] sm:$0xff]  ;;  %v95_v51 = vld [vmem:[#allocation5 + $0xb8] sm:$0xff]  ;;  %v1020_v54 = vld [vmem:[#allocation2 + $0xe8] sm:$0xff] }
  0x2f   :  { %136 = vmatprep.subr.mxu0 %v94_v17  ;;  %852 = vmatprep.subr.mxu1 %v94_v17  ;;  %v92_v52 = vld [vmem:[#allocation5 + $0xa0] sm:$0xff]  ;;  %v89_v55 = vld [vmem:[#allocation5 + $0x88] sm:$0xff]  ;;  %v86_v56 = vld [vmem:[#allocation5 + $0x70] sm:$0xff] }
  0x30   :  { %137 = vmatpush1.msra.mxu0 %v93_v18  ;;  %868 = vmatpush1.msra.mxu1 %v93_v18  ;;  %v46_v57 = vld [vmem:[#allocation2 + $0x30] sm:$0xff]  ;;  %v83_v59 = vld [vmem:[#allocation5 + $0x58] sm:$0xff]  ;;  %v80_v60 = vld [vmem:[#allocation5 + $0x40] sm:$0xff] }
  0x31   :  { %138 = vmatprep.subr.mxu0 %v91_v19  ;;  %853 = vmatprep.subr.mxu1 %v91_v19  ;;  %v1025_v58 = vld [vmem:[#allocation2 + $0xf0] sm:$0xff]  ;;  %v47_v61 = vld [vmem:[#allocation2 + $0x38] sm:$0xff]  ;;  %v77_v63 = vld [vmem:[#allocation5 + $0x28] sm:$0xff] }
  0x32   :  { %139 = vmatpush1.msra.mxu0 %v90_v20  ;;  %869 = vmatpush1.msra.mxu1 %v90_v20  ;;  %v1030_v62 = vld [vmem:[#allocation2 + $0xf8] sm:$0xff]  ;;  %v74_v1 = vld [vmem:[#allocation5 + $0x10] sm:$0xff]  ;;  %v48_v2 = vld [vmem:[#allocation2 + $0x40] sm:$0xff] }
  0x33   :  { %140 = vmatprep.subr.mxu0 %v88_v21  ;;  %854 = vmatprep.subr.mxu1 %v88_v21  ;;  %v49_v3 = vld [vmem:[#allocation2 + $0x48] sm:$0xff]  ;;  %v50_v4 = vld [vmem:[#allocation2 + $0x50] sm:$0xff]  ;;  %v51_v5 = vld [vmem:[#allocation2 + $0x58] sm:$0xff] }
  0x34   :  { %141 = vmatpush1.msra.mxu0 %v87_v22  ;;  %870 = vmatpush1.msra.mxu1 %v87_v22  ;;  %v52_v6 = vld [vmem:[#allocation2 + $0x60] sm:$0xff]  ;;  %v53_v7 = vld [vmem:[#allocation2 + $0x68] sm:$0xff]  ;;  %v54_v8 = vld [vmem:[#allocation2 + $0x70] sm:$0xff] }
  0x35   :  { %142 = vmatprep.subr.mxu0 %v85_v23  ;;  %855 = vmatprep.subr.mxu1 %v85_v23  ;;  %v55_v9 = vld [vmem:[#allocation2 + $0x78] sm:$0xff]  ;;  %v56_v10 = vld [vmem:[#allocation2 + $0x80] sm:$0xff]  ;;  %v57_v11 = vld [vmem:[#allocation2 + $0x88] sm:$0xff] }
  0x36   :  { %143 = vmatpush1.msra.mxu0 %v84_v24  ;;  %871 = vmatpush1.msra.mxu1 %v84_v24  ;;  %v58_v12 = vld [vmem:[#allocation2 + $0x90] sm:$0xff]  ;;  %v59_v13 = vld [vmem:[#allocation2 + $0x98] sm:$0xff]  ;;  %v60_v14 = vld [vmem:[#allocation2 + $0xa0] sm:$0xff] }
  0x37   :  { %144 = vmatprep.subr.mxu0 %v82_v25  ;;  %856 = vmatprep.subr.mxu1 %v82_v25  ;;  %v61_v15 = vld [vmem:[#allocation2 + $0xa8] sm:$0xff]  ;;  %v62_v16 = vld [vmem:[#allocation2 + $0xb0] sm:$0xff]  ;;  %v63_v17 = vld [vmem:[#allocation2 + $0xb8] sm:$0xff] }
  0x38   :  { %145 = vmatpush1.msra.mxu0 %v81_v26  ;;  %872 = vmatpush1.msra.mxu1 %v81_v26 }
  0x39   :  { %146 = vmatprep.subr.mxu0 %v79_v27  ;;  %857 = vmatprep.subr.mxu1 %v79_v27 }
  0x3a   :  { %147 = vmatpush1.msra.mxu0 %v78_v28  ;;  %873 = vmatpush1.msra.mxu1 %v78_v28 }
  0x3b   :  { %148 = vmatprep.subr.mxu0 %v76_v29  ;;  %858 = vmatprep.subr.mxu1 %v76_v29 }
  0x3c   :  { %149 = vmatpush1.msra.mxu0 %v75_v30  ;;  %874 = vmatpush1.msra.mxu1 %v75_v30 }
  0x3d   :  { %150 = vmatprep.subr.mxu0 %v73_v31  ;;  %859 = vmatprep.subr.mxu1 %v73_v31 }
  0x3e   :  { %151 = vmatpush1.msra.mxu0 %v72_v32  ;;  %875 = vmatpush1.msra.mxu1 %v72_v32 }
  0x3f   :  { %185 = vmatmul.mubr.f32.vlgmr.msra.gmra.mxu0 %v984_v33  ;;  %329 = vmatmul.mubr.f32.vlgmr.msra.gmra.mxu1 %v986_v34 }
  0x40   :  { %764 = vmatprep.subr.mxu1 %v119_v35  ;;  %190 = vmatprep.mubr.f32.mxu0 %v956_v0 }
  0x41   :  { %765 = vmatpush3.msra.mxu1 %v119_v35  ;;  %334 = vmatprep.mubr.f32.mxu1 %v956_v0 }
  0x42   :  { %766 = vmatprep.subr.mxu1 %v116_v36 }
  0x43   :  { %767 = vmatpush3.msra.mxu1 %v116_v36  ;;  %191 = vmatmul.mubr.f32.gmra.mxu0 %v991_v37 }
  0x44   :  { %335 = vmatmul.mubr.f32.gmra.mxu1 %v994_v38  ;;  %768 = vmatprep.subr.mxu1 %v113_v39 }
  0x45   :  { %769 = vmatpush3.msra.mxu1 %v113_v39  ;;  %196 = vmatprep.mubr.f32.mxu0 %v956_v0 }
  0x46   :  { %770 = vmatprep.subr.mxu1 %v110_v40  ;;  %340 = vmatprep.mubr.f32.mxu1 %v956_v0 }
  0x47   :  { %771 = vmatpush3.msra.mxu1 %v110_v40  ;;  %197 = vmatmul.mubr.f32.gmra.mxu0 %v998_v41 }
  0x48   :  { %341 = vmatmul.mubr.f32.gmra.mxu1 %v1001_v42  ;;  %772 = vmatprep.subr.mxu1 %v107_v43 }
  0x49   :  { %773 = vmatpush3.msra.mxu1 %v107_v43  ;;  %202 = vmatprep.mubr.f32.mxu0 %v956_v0 }
  0x4a   :  { %774 = vmatprep.subr.mxu1 %v104_v44  ;;  %346 = vmatprep.mubr.f32.mxu1 %v956_v0 }
  0x4b   :  { %775 = vmatpush3.msra.mxu1 %v104_v44  ;;  %203 = vmatmul.mubr.f32.gmra.mxu0 %v1006_v45 }
  0x4c   :  { %347 = vmatmul.mubr.f32.gmra.mxu1 %v1009_v46  ;;  %776 = vmatprep.subr.mxu1 %v101_v47 }
  0x4d   :  { %777 = vmatpush3.msra.mxu1 %v101_v47  ;;  %208 = vmatprep.mubr.f32.mxu0 %v956_v0 }
  0x4e   :  { %778 = vmatprep.subr.mxu1 %v98_v48  ;;  %352 = vmatprep.mubr.f32.mxu1 %v956_v0 }
  0x4f   :  { %779 = vmatpush3.msra.mxu1 %v98_v48  ;;  %209 = vmatmul.mubr.f32.gmra.mxu0 %v44_v49 }
  0x50   :  { %353 = vmatmul.mubr.f32.gmra.mxu1 %v1015_v50  ;;  %780 = vmatprep.subr.mxu1 %v95_v51 }
  0x51   :  { %781 = vmatpush3.msra.mxu1 %v95_v51  ;;  %214 = vmatprep.mubr.f32.mxu0 %v956_v0 }
  0x52   :  { %782 = vmatprep.subr.mxu1 %v92_v52  ;;  %358 = vmatprep.mubr.f32.mxu1 %v956_v0 }
  0x53   :  { %783 = vmatpush3.msra.mxu1 %v92_v52  ;;  %215 = vmatmul.mubr.f32.gmra.mxu0 %v45_v53 }
  0x54   :  { %359 = vmatmul.mubr.f32.gmra.mxu1 %v1020_v54  ;;  %784 = vmatprep.subr.mxu1 %v89_v55 }
  0x55   :  { %785 = vmatpush3.msra.mxu1 %v89_v55  ;;  %220 = vmatprep.mubr.f32.mxu0 %v956_v0 }
  0x56   :  { %786 = vmatprep.subr.mxu1 %v86_v56  ;;  %364 = vmatprep.mubr.f32.mxu1 %v956_v0 }
  0x57   :  { %787 = vmatpush3.msra.mxu1 %v86_v56  ;;  %221 = vmatmul.mubr.f32.gmra.mxu0 %v46_v57 }
  0x58   :  { %365 = vmatmul.mubr.f32.gmra.mxu1 %v1025_v58  ;;  %788 = vmatprep.subr.mxu1 %v83_v59 }
  0x59   :  { %789 = vmatpush3.msra.mxu1 %v83_v59  ;;  %226 = vmatprep.mubr.f32.mxu0 %v956_v0 }
  0x5a   :  { %790 = vmatprep.subr.mxu1 %v80_v60  ;;  %370 = vmatprep.mubr.f32.mxu1 %v956_v0 }
  0x5b   :  { %791 = vmatpush3.msra.mxu1 %v80_v60  ;;  %227 = vmatmul.mubr.f32.gmra.mxu0 %v47_v61 }
  0x5c   :  { %371 = vmatmul.mubr.f32.gmra.mxu1 %v1030_v62  ;;  %792 = vmatprep.subr.mxu1 %v77_v63 }
  0x5d   :  { %793 = vmatpush3.msra.mxu1 %v77_v63  ;;  %232 = vmatprep.mubr.f32.mxu0 %v956_v0 }
  0x5e   :  { %794 = vmatprep.subr.mxu1 %v74_v1  ;;  %796 = vmatprep.mubr.f32.mxu1 %v984_v33 }
  0x5f   :  { %795 = vmatpush3.msra.mxu1 %v74_v1  ;;  %233 = vmatmul.mubr.f32.gmra.mxu0 %v48_v2 }
  0x60   :  { %797 = vmatmul.mubr.f32.vlgmr.msra.gmra.mxu1 %v991_v37  ;;  %238 = vmatprep.mubr.f32.mxu0 %v956_v0 }
  0x61   :  { %799 = vmatprep.mubr.f32.mxu1 %v998_v41 }
  0x63   :  { %239 = vmatmul.mubr.f32.gmra.mxu0 %v49_v3 }
  0x64   :  { %800 = vmatmul.mubr.f32.gmra.mxu1 %v1006_v45  ;;  %244 = vmatprep.mubr.f32.mxu0 %v956_v0 }
  0x65   :  { %802 = vmatprep.mubr.f32.mxu1 %v44_v49 }
  0x67   :  { %245 = vmatmul.mubr.f32.gmra.mxu0 %v50_v4 }
  0x68   :  { %803 = vmatmul.mubr.f32.gmra.mxu1 %v45_v53  ;;  %250 = vmatprep.mubr.f32.mxu0 %v956_v0 }
  0x69   :  { %805 = vmatprep.mubr.f32.mxu1 %v46_v57 }
  0x6b   :  { %251 = vmatmul.mubr.f32.gmra.mxu0 %v51_v5 }
  0x6c   :  { %806 = vmatmul.mubr.f32.gmra.mxu1 %v47_v61  ;;  %256 = vmatprep.mubr.f32.mxu0 %v956_v0 }
  0x6d   :  { %808 = vmatprep.mubr.f32.mxu1 %v48_v2 }
  0x6f   :  { %257 = vmatmul.mubr.f32.gmra.mxu0 %v52_v6 }
  0x70   :  { %809 = vmatmul.mubr.f32.gmra.mxu1 %v49_v3  ;;  %262 = vmatprep.mubr.f32.mxu0 %v956_v0 }
  0x71   :  { %811 = vmatprep.mubr.f32.mxu1 %v50_v4 }
  0x73   :  { %263 = vmatmul.mubr.f32.gmra.mxu0 %v53_v7 }
  0x74   :  { %812 = vmatmul.mubr.f32.gmra.mxu1 %v51_v5  ;;  %268 = vmatprep.mubr.f32.mxu0 %v956_v0 }
  0x75   :  { %814 = vmatprep.mubr.f32.mxu1 %v52_v6 }
  0x77   :  { %269 = vmatmul.mubr.f32.gmra.mxu0 %v54_v8 }
  0x78   :  { %815 = vmatmul.mubr.f32.gmra.mxu1 %v53_v7  ;;  %274 = vmatprep.mubr.f32.mxu0 %v956_v0 }
  0x79   :  { %817 = vmatprep.mubr.f32.mxu1 %v54_v8 }
  0x7b   :  { %275 = vmatmul.mubr.f32.gmra.mxu0 %v55_v9 }
  0x7c   :  { %818 = vmatmul.mubr.f32.gmra.mxu1 %v55_v9  ;;  %280 = vmatprep.mubr.f32.mxu0 %v956_v0 }
  0x7d   :  { %820 = vmatprep.mubr.f32.mxu1 %v56_v10 }
  0x7f   :  { %281 = vmatmul.mubr.f32.gmra.mxu0 %v56_v10 }
  0x80   :  { %821 = vmatmul.mubr.f32.gmra.mxu1 %v57_v11  ;;  %286 = vmatprep.mubr.f32.mxu0 %v956_v0 }
  0x81   :  { %823 = vmatprep.mubr.f32.mxu1 %v58_v12 }
  0x83   :  { %287 = vmatmul.mubr.f32.gmra.mxu0 %v57_v11 }
  0x84   :  { %824 = vmatmul.mubr.f32.gmra.mxu1 %v59_v13  ;;  %292 = vmatprep.mubr.f32.mxu0 %v956_v0 }
  0x85   :  { %826 = vmatprep.mubr.f32.mxu1 %v60_v14 }
  0x87   :  { %293 = vmatmul.mubr.f32.gmra.mxu0 %v58_v12 }
  0x88   :  { %827 = vmatmul.mubr.f32.gmra.mxu1 %v61_v15  ;;  %298 = vmatprep.mubr.f32.mxu0 %v956_v0 }
  0x89   :  { %829 = vmatprep.mubr.f32.mxu1 %v62_v16 }
  0x8b   :  { %299 = vmatmul.mubr.f32.gmra.mxu0 %v59_v13 }
  0x8c   :  { %830 = vmatmul.mubr.f32.gmra.mxu1 %v63_v17  ;;  %304 = vmatprep.mubr.f32.mxu0 %v956_v0 }
  0x8d   :  { %832 = vmatprep.mubr.f32.mxu1 %v986_v34 }
  0x8f   :  { %305 = vmatmul.mubr.f32.gmra.mxu0 %v60_v14 }
  0x90   :  { %833 = vmatmul.mubr.f32.gmra.mxu1 %v994_v38  ;;  %310 = vmatprep.mubr.f32.mxu0 %v956_v0 }
  0x91   :  { %835 = vmatprep.mubr.f32.mxu1 %v1001_v42 }
  0x93   :  { %311 = vmatmul.mubr.f32.gmra.mxu0 %v61_v15 }
  0x94   :  { %836 = vmatmul.mubr.f32.gmra.mxu1 %v1009_v46  ;;  %316 = vmatprep.mubr.f32.mxu0 %v956_v0 }
  0x95   :  { %838 = vmatprep.mubr.f32.mxu1 %v1015_v50 }
  0x97   :  { %317 = vmatmul.mubr.f32.gmra.mxu0 %v62_v16 }
  0x98   :  { %839 = vmatmul.mubr.f32.gmra.mxu1 %v1020_v54  ;;  %322 = vmatprep.mubr.f32.mxu0 %v956_v0 }
  0x99   :  { %841 = vmatprep.mubr.f32.mxu1 %v1025_v58 }
  0x9b   :  { %323 = vmatmul.mubr.f32.gmra.mxu0 %v63_v17 }
  0x9c   :  { %842 = vmatmul.mubr.f32.gmra.mxu1 %v1030_v62 }
  0xff   :  { %v186_v18 = vpop.f32.mrf.mxu0  ;;  %v330_v19 = vpop.f32.mrf.mxu1 }
 0x100   :  { %602 = vst [vmem:[#allocation7] sm:$0xff] %v186_v18  ;;  %674 = vst [vmem:[#allocation7 + $0x240] sm:$0xff] %v330_v19 }
 0x101   :  { %v188_v20 = vpop.f32.mrf.mxu0  ;;  %v332_v21 = vpop.f32.mrf.mxu1 }
 0x102   :  { %603 = vst [vmem:[#allocation7 + $0x8] sm:$0xff] %v188_v20  ;;  %675 = vst [vmem:[#allocation7 + $0x248] sm:$0xff] %v332_v21 }
 0x103   :  { %v192_v22 = vpop.f32.mrf.mxu0 }
 0x104   :  { %605 = vst [vmem:[#allocation7 + $0x18] sm:$0xff] %v192_v22  ;;  %v336_v23 = vpop.f32.mrf.mxu1 }
 0x105   :  { %677 = vst [vmem:[#allocation7 + $0x258] sm:$0xff] %v336_v23  ;;  %v194_v24 = vpop.f32.mrf.mxu0 }
 0x106   :  { %606 = vst [vmem:[#allocation7 + $0x20] sm:$0xff] %v194_v24  ;;  %v338_v0 = vpop.f32.mrf.mxu1 }
 0x107   :  { %678 = vst [vmem:[#allocation7 + $0x260] sm:$0xff] %v338_v0  ;;  %v198_v25 = vpop.f32.mrf.mxu0 }
 0x108   :  { %608 = vst [vmem:[#allocation7 + $0x30] sm:$0xff] %v198_v25  ;;  %v342_v26 = vpop.f32.mrf.mxu1 }
 0x109   :  { %680 = vst [vmem:[#allocation7 + $0x270] sm:$0xff] %v342_v26  ;;  %v200_v27 = vpop.f32.mrf.mxu0 }
 0x10a   :  { %609 = vst [vmem:[#allocation7 + $0x38] sm:$0xff] %v200_v27  ;;  %v344_v28 = vpop.f32.mrf.mxu1 }
 0x10b   :  { %681 = vst [vmem:[#allocation7 + $0x278] sm:$0xff] %v344_v28  ;;  %v204_v29 = vpop.f32.mrf.mxu0 }
 0x10c   :  { %611 = vst [vmem:[#allocation7 + $0x48] sm:$0xff] %v204_v29  ;;  %v348_v30 = vpop.f32.mrf.mxu1 }
 0x10d   :  { %683 = vst [vmem:[#allocation7 + $0x288] sm:$0xff] %v348_v30  ;;  %v206_v31 = vpop.f32.mrf.mxu0 }
 0x10e   :  { %612 = vst [vmem:[#allocation7 + $0x50] sm:$0xff] %v206_v31  ;;  %v350_v32 = vpop.f32.mrf.mxu1 }
 0x10f   :  { %684 = vst [vmem:[#allocation7 + $0x290] sm:$0xff] %v350_v32  ;;  %v210_v33 = vpop.f32.mrf.mxu0 }
 0x110   :  { %614 = vst [vmem:[#allocation7 + $0x60] sm:$0xff] %v210_v33  ;;  %v354_v34 = vpop.f32.mrf.mxu1 }
 0x111   :  { %686 = vst [vmem:[#allocation7 + $0x2a0] sm:$0xff] %v354_v34  ;;  %v212_v35 = vpop.f32.mrf.mxu0 }
 0x112   :  { %615 = vst [vmem:[#allocation7 + $0x68] sm:$0xff] %v212_v35  ;;  %v356_v36 = vpop.f32.mrf.mxu1 }
 0x113   :  { %687 = vst [vmem:[#allocation7 + $0x2a8] sm:$0xff] %v356_v36  ;;  %v216_v37 = vpop.f32.mrf.mxu0 }
 0x114   :  { %617 = vst [vmem:[#allocation7 + $0x78] sm:$0xff] %v216_v37  ;;  %v360_v38 = vpop.f32.mrf.mxu1 }
 0x115   :  { %689 = vst [vmem:[#allocation7 + $0x2b8] sm:$0xff] %v360_v38  ;;  %v218_v39 = vpop.f32.mrf.mxu0 }
 0x116   :  { %618 = vst [vmem:[#allocation7 + $0x80] sm:$0xff] %v218_v39  ;;  %v362_v40 = vpop.f32.mrf.mxu1 }
 0x117   :  { %690 = vst [vmem:[#allocation7 + $0x2c0] sm:$0xff] %v362_v40  ;;  %v222_v41 = vpop.f32.mrf.mxu0 }
 0x118   :  { %620 = vst [vmem:[#allocation7 + $0x90] sm:$0xff] %v222_v41  ;;  %v366_v42 = vpop.f32.mrf.mxu1 }
 0x119   :  { %692 = vst [vmem:[#allocation7 + $0x2d0] sm:$0xff] %v366_v42  ;;  %v224_v43 = vpop.f32.mrf.mxu0 }
 0x11a   :  { %621 = vst [vmem:[#allocation7 + $0x98] sm:$0xff] %v224_v43  ;;  %v368_v44 = vpop.f32.mrf.mxu1 }
 0x11b   :  { %693 = vst [vmem:[#allocation7 + $0x2d8] sm:$0xff] %v368_v44  ;;  %v228_v45 = vpop.f32.mrf.mxu0 }
 0x11c   :  { %623 = vst [vmem:[#allocation7 + $0xa8] sm:$0xff] %v228_v45  ;;  %v372_v46 = vpop.f32.mrf.mxu1 }
 0x11d   :  { %695 = vst [vmem:[#allocation7 + $0x2e8] sm:$0xff] %v372_v46  ;;  %v230_v47 = vpop.f32.mrf.mxu0 }
 0x11e   :  { %624 = vst [vmem:[#allocation7 + $0xb0] sm:$0xff] %v230_v47  ;;  %v374_v48 = vpop.f32.mrf.mxu1 }
 0x11f   :  { %696 = vst [vmem:[#allocation7 + $0x2f0] sm:$0xff] %v374_v48  ;;  %v234_v49 = vpop.f32.mrf.mxu0 }
 0x120   :  { %626 = vst [vmem:[#allocation7 + $0xc0] sm:$0xff] %v234_v49  ;;  %v798_v50 = vpop.f32.mrf.mxu1 }
 0x121   :  { %607 = vst [vmem:[#allocation7 + $0x28] sm:$0xff] %v798_v50  ;;  %v236_v51 = vpop.f32.mrf.mxu0 }
 0x122   :  { %627 = vst [vmem:[#allocation7 + $0xc8] sm:$0xff] %v236_v51  ;;  %v443_v52 = vpop.f32.mrf.mxu1 }
 0x123   :  { %604 = vst [vmem:[#allocation7 + $0x10] sm:$0xff] %v443_v52  ;;  %v240_v53 = vpop.f32.mrf.mxu0 }
 0x124   :  { %629 = vst [vmem:[#allocation7 + $0xd8] sm:$0xff] %v240_v53  ;;  %v801_v54 = vpop.f32.mrf.mxu1 }
 0x125   :  { %613 = vst [vmem:[#allocation7 + $0x58] sm:$0xff] %v801_v54  ;;  %v242_v55 = vpop.f32.mrf.mxu0 }
 0x126   :  { %630 = vst [vmem:[#allocation7 + $0xe0] sm:$0xff] %v242_v55  ;;  %v453_v56 = vpop.f32.mrf.mxu1 }
 0x127   :  { %610 = vst [vmem:[#allocation7 + $0x40] sm:$0xff] %v453_v56  ;;  %v246_v57 = vpop.f32.mrf.mxu0 }
 0x128   :  { %632 = vst [vmem:[#allocation7 + $0xf0] sm:$0xff] %v246_v57  ;;  %v804_v58 = vpop.f32.mrf.mxu1 }
 0x129   :  { %619 = vst [vmem:[#allocation7 + $0x88] sm:$0xff] %v804_v58  ;;  %v248_v59 = vpop.f32.mrf.mxu0 }
 0x12a   :  { %633 = vst [vmem:[#allocation7 + $0xf8] sm:$0xff] %v248_v59  ;;  %v463_v60 = vpop.f32.mrf.mxu1 }
 0x12b   :  { %616 = vst [vmem:[#allocation7 + $0x70] sm:$0xff] %v463_v60  ;;  %v252_v61 = vpop.f32.mrf.mxu0 }
 0x12c   :  { %635 = vst [vmem:[#allocation7 + $0x108] sm:$0xff] %v252_v61  ;;  %v807_v62 = vpop.f32.mrf.mxu1 }
 0x12d   :  { %625 = vst [vmem:[#allocation7 + $0xb8] sm:$0xff] %v807_v62  ;;  %v254_v63 = vpop.f32.mrf.mxu0 }
 0x12e   :  { %636 = vst [vmem:[#allocation7 + $0x110] sm:$0xff] %v254_v63  ;;  %v473_v1 = vpop.f32.mrf.mxu1 }
 0x12f   :  { %622 = vst [vmem:[#allocation7 + $0xa0] sm:$0xff] %v473_v1  ;;  %v258_v2 = vpop.f32.mrf.mxu0 }
 0x130   :  { %638 = vst [vmem:[#allocation7 + $0x120] sm:$0xff] %v258_v2  ;;  %v810_v3 = vpop.f32.mrf.mxu1 }
 0x131   :  { %631 = vst [vmem:[#allocation7 + $0xe8] sm:$0xff] %v810_v3  ;;  %v260_v4 = vpop.f32.mrf.mxu0 }
 0x132   :  { %639 = vst [vmem:[#allocation7 + $0x128] sm:$0xff] %v260_v4  ;;  %v483_v5 = vpop.f32.mrf.mxu1 }
 0x133   :  { %628 = vst [vmem:[#allocation7 + $0xd0] sm:$0xff] %v483_v5  ;;  %v264_v6 = vpop.f32.mrf.mxu0 }
 0x134   :  { %641 = vst [vmem:[#allocation7 + $0x138] sm:$0xff] %v264_v6  ;;  %v813_v7 = vpop.f32.mrf.mxu1 }
 0x135   :  { %637 = vst [vmem:[#allocation7 + $0x118] sm:$0xff] %v813_v7  ;;  %v266_v8 = vpop.f32.mrf.mxu0 }
 0x136   :  { %642 = vst [vmem:[#allocation7 + $0x140] sm:$0xff] %v266_v8  ;;  %v493_v9 = vpop.f32.mrf.mxu1 }
 0x137   :  { %634 = vst [vmem:[#allocation7 + $0x100] sm:$0xff] %v493_v9  ;;  %v270_v10 = vpop.f32.mrf.mxu0 }
 0x138   :  { %644 = vst [vmem:[#allocation7 + $0x150] sm:$0xff] %v270_v10  ;;  %v816_v11 = vpop.f32.mrf.mxu1 }
 0x139   :  { %643 = vst [vmem:[#allocation7 + $0x148] sm:$0xff] %v816_v11  ;;  %v272_v12 = vpop.f32.mrf.mxu0 }
 0x13a   :  { %645 = vst [vmem:[#allocation7 + $0x158] sm:$0xff] %v272_v12  ;;  %v503_v13 = vpop.f32.mrf.mxu1 }
 0x13b   :  { %640 = vst [vmem:[#allocation7 + $0x130] sm:$0xff] %v503_v13  ;;  %v276_v14 = vpop.f32.mrf.mxu0 }
 0x13c   :  { %647 = vst [vmem:[#allocation7 + $0x168] sm:$0xff] %v276_v14  ;;  %v819_v15 = vpop.f32.mrf.mxu1 }
 0x13d   :  { %649 = vst [vmem:[#allocation7 + $0x178] sm:$0xff] %v819_v15  ;;  %v278_v16 = vpop.f32.mrf.mxu0 }
 0x13e   :  { %648 = vst [vmem:[#allocation7 + $0x170] sm:$0xff] %v278_v16  ;;  %v513_v17 = vpop.f32.mrf.mxu1 }
 0x13f   :  { %646 = vst [vmem:[#allocation7 + $0x160] sm:$0xff] %v513_v17  ;;  %v282_v18 = vpop.f32.mrf.mxu0 }
 0x140   :  { %650 = vst [vmem:[#allocation7 + $0x180] sm:$0xff] %v282_v18  ;;  %v822_v19 = vpop.f32.mrf.mxu1 }
 0x141   :  { %655 = vst [vmem:[#allocation7 + $0x1a8] sm:$0xff] %v822_v19  ;;  %v284_v20 = vpop.f32.mrf.mxu0 }
 0x142   :  { %651 = vst [vmem:[#allocation7 + $0x188] sm:$0xff] %v284_v20  ;;  %v523_v21 = vpop.f32.mrf.mxu1 }
 0x143   :  { %652 = vst [vmem:[#allocation7 + $0x190] sm:$0xff] %v523_v21  ;;  %v288_v22 = vpop.f32.mrf.mxu0 }
 0x144   :  { %653 = vst [vmem:[#allocation7 + $0x198] sm:$0xff] %v288_v22  ;;  %v825_v23 = vpop.f32.mrf.mxu1 }
 0x145   :  { %661 = vst [vmem:[#allocation7 + $0x1d8] sm:$0xff] %v825_v23  ;;  %v290_v24 = vpop.f32.mrf.mxu0 }
 0x146   :  { %654 = vst [vmem:[#allocation7 + $0x1a0] sm:$0xff] %v290_v24  ;;  %v533_v0 = vpop.f32.mrf.mxu1 }
 0x147   :  { %658 = vst [vmem:[#allocation7 + $0x1c0] sm:$0xff] %v533_v0  ;;  %v294_v25 = vpop.f32.mrf.mxu0 }
 0x148   :  { %656 = vst [vmem:[#allocation7 + $0x1b0] sm:$0xff] %v294_v25  ;;  %v828_v26 = vpop.f32.mrf.mxu1 }
 0x149   :  { %667 = vst [vmem:[#allocation7 + $0x208] sm:$0xff] %v828_v26  ;;  %v296_v27 = vpop.f32.mrf.mxu0 }
 0x14a   :  { %657 = vst [vmem:[#allocation7 + $0x1b8] sm:$0xff] %v296_v27  ;;  %v543_v28 = vpop.f32.mrf.mxu1 }
 0x14b   :  { %664 = vst [vmem:[#allocation7 + $0x1f0] sm:$0xff] %v543_v28  ;;  %v300_v29 = vpop.f32.mrf.mxu0 }
 0x14c   :  { %659 = vst [vmem:[#allocation7 + $0x1c8] sm:$0xff] %v300_v29  ;;  %v831_v30 = vpop.f32.mrf.mxu1 }
 0x14d   :  { %673 = vst [vmem:[#allocation7 + $0x238] sm:$0xff] %v831_v30  ;;  %v302_v31 = vpop.f32.mrf.mxu0 }
 0x14e   :  { %660 = vst [vmem:[#allocation7 + $0x1d0] sm:$0xff] %v302_v31  ;;  %v553_v32 = vpop.f32.mrf.mxu1 }
 0x14f   :  { %670 = vst [vmem:[#allocation7 + $0x220] sm:$0xff] %v553_v32  ;;  %v306_v33 = vpop.f32.mrf.mxu0 }
 0x150   :  { %662 = vst [vmem:[#allocation7 + $0x1e0] sm:$0xff] %v306_v33  ;;  %v834_v34 = vpop.f32.mrf.mxu1 }
 0x151   :  { %679 = vst [vmem:[#allocation7 + $0x268] sm:$0xff] %v834_v34  ;;  %v308_v35 = vpop.f32.mrf.mxu0 }
 0x152   :  { %663 = vst [vmem:[#allocation7 + $0x1e8] sm:$0xff] %v308_v35  ;;  %v563_v36 = vpop.f32.mrf.mxu1 }
 0x153   :  { %676 = vst [vmem:[#allocation7 + $0x250] sm:$0xff] %v563_v36  ;;  %v312_v37 = vpop.f32.mrf.mxu0 }
 0x154   :  { %665 = vst [vmem:[#allocation7 + $0x1f8] sm:$0xff] %v312_v37  ;;  %v837_v38 = vpop.f32.mrf.mxu1 }
 0x155   :  { %685 = vst [vmem:[#allocation7 + $0x298] sm:$0xff] %v837_v38  ;;  %v314_v39 = vpop.f32.mrf.mxu0 }
 0x156   :  { %666 = vst [vmem:[#allocation7 + $0x200] sm:$0xff] %v314_v39  ;;  %v573_v40 = vpop.f32.mrf.mxu1 }
 0x157   :  { %682 = vst [vmem:[#allocation7 + $0x280] sm:$0xff] %v573_v40  ;;  %v318_v41 = vpop.f32.mrf.mxu0 }
 0x158   :  { %668 = vst [vmem:[#allocation7 + $0x210] sm:$0xff] %v318_v41  ;;  %v840_v42 = vpop.f32.mrf.mxu1 }
 0x159   :  { %691 = vst [vmem:[#allocation7 + $0x2c8] sm:$0xff] %v840_v42  ;;  %v320_v43 = vpop.f32.mrf.mxu0 }
 0x15a   :  { %669 = vst [vmem:[#allocation7 + $0x218] sm:$0xff] %v320_v43  ;;  %v583_v44 = vpop.f32.mrf.mxu1 }
 0x15b   :  { %688 = vst [vmem:[#allocation7 + $0x2b0] sm:$0xff] %v583_v44  ;;  %v324_v45 = vpop.f32.mrf.mxu0 }
 0x15c   :  { %671 = vst [vmem:[#allocation7 + $0x228] sm:$0xff] %v324_v45  ;;  %v843_v46 = vpop.f32.mrf.mxu1 }
 0x15d   :  { %697 = vst [vmem:[#allocation7 + $0x2f8] sm:$0xff] %v843_v46  ;;  %v326_v47 = vpop.f32.mrf.mxu0 }
 0x15e   :  { %672 = vst [vmem:[#allocation7 + $0x230] sm:$0xff] %v326_v47  ;;  %v593_v48 = vpop.f32.mrf.mxu1 }
 0x15f   :  { %694 = vst [vmem:[#allocation7 + $0x2e0] sm:$0xff] %v593_v48 }
 0x160   :  { %935 = shalt.err (!%p932_p0)
}
 0x161   :  { %709 = dma.vmem_to_hbm [thread:$0]  %s704_s1, 12288, %s1070_s2, [#allocation4], %s954_s19, %s954_s19, %s955_s20  }
 0x162   :  { %948 = dma.done.wait [#allocation4], 12288  }
 0x163   :  { %949 = vsyncadd [#allocation4], 4294955008 }
 0x164   :  { %713 = vsyncpa [#allocation3], 1 }
 0x165   :  { %714 = vsyncpa [#allocation6], 1 }
 0x166   :  { %715 = vsyncpa [#allocation4], 1 }

</bundles_post_ra>
